<compile_context>
chip_gen: v7x
topology: tpu7x:2x2x1
jax: 0.10.0
libtpu: 0.0.40
codegen_flags: <defaults>
</compile_context>

<pallas_src>
import jax
import jax.numpy as jnp
from jax.experimental import pallas as pl
from jax.experimental.pallas import tpu as pltpu

SUBLANE = 8  # f32 second-to-last-dim tile


def _cdiv(a, b):
    return (a + b - 1) // b


def _round_up(x, m):
    return ((x + m - 1) // m) * m


def mlp_kernel(x_ref, w1_ref, b1_ref, w2_ref, b2_ref, o_ref):
    # Cast the streamed x tile to bf16 in-kernel (no wrapper pad/cast pass).
    x = x_ref[...].astype(jnp.bfloat16)
    # Hidden layer: MXU matmul (bf16 in / f32 acc) + bias + ReLU in f32.
    h = jnp.dot(x, w1_ref[...], preferred_element_type=jnp.float32)
    h = jnp.maximum(h + b1_ref[...], 0.0)
    # Output layer.
    o = jnp.dot(h.astype(jnp.bfloat16), w2_ref[...],
                preferred_element_type=jnp.float32)
    o_ref[...] = (o + b2_ref[...]).astype(o_ref.dtype)


def mlp_forward(x, w1, b1, w2, b2, *, block_m=2048):
    """Fused 2-layer MLP forward.

    x:  [N, c_in]        f32
    w1: [c_in, c_hid]    (input-major, i.e. transpose of torch Linear.weight)
    b1: [1, c_hid]
    w2: [c_hid, c_out]
    b2: [1, c_out]
    returns [N, c_out]   f32
    """
    N, c_in = x.shape
    c_hid = w1.shape[1]
    c_out = w2.shape[1]
    assert b1.shape == (1, c_hid), b1.shape
    assert b2.shape == (1, c_out), b2.shape

    # Balanced row tiling: split N into `steps` near-equal tiles so a ragged N
    # never produces a mostly-padded tail tile, then round to the sublane.
    steps = max(_cdiv(N, block_m), 1)
    tm = min(_round_up(_cdiv(N, steps), SUBLANE), _round_up(N, SUBLANE))
    n_p = _round_up(N, tm)
    grid_m = n_p // tm

    # Only the batch axis is (lightly) padded; feature dims stay natural.
    x_p = x if n_p == N else jnp.pad(x, ((0, n_p - N), (0, 0)))

    # Tiny, VMEM-resident weights: one-time bf16 cast; biases stay f32.
    w1_b = w1.astype(jnp.bfloat16)
    w2_b = w2.astype(jnp.bfloat16)
    b1_f = b1.astype(jnp.float32)
    b2_f = b2.astype(jnp.float32)

    out_p = pl.pallas_call(
        mlp_kernel,
        out_shape=jax.ShapeDtypeStruct((n_p, c_out), jnp.float32),
        grid_spec=pltpu.PrefetchScalarGridSpec(
            num_scalar_prefetch=0,
            grid=(grid_m,),
            in_specs=[
                # Streamed x row tile (double-buffered by Pallas).
                pl.BlockSpec((tm, c_in), lambda i: (i, 0)),
                # Resident weights / biases (same block every step -> no re-DMA).
                pl.BlockSpec((c_in, c_hid), lambda i: (0, 0)),
                pl.BlockSpec((1, c_hid), lambda i: (0, 0)),
                pl.BlockSpec((c_hid, c_out), lambda i: (0, 0)),
                pl.BlockSpec((1, c_out), lambda i: (0, 0)),
            ],
            out_specs=pl.BlockSpec((tm, c_out), lambda i: (i, 0)),
        ),
        compiler_params=pltpu.CompilerParams(
            dimension_semantics=("parallel",),
        ),
    )(x_p, w1_b, b1_f, w2_b, b2_f)

    return out_p if n_p == N else out_p[:N]


def mlp_reference(x, w1, b1, w2, b2):
    h = jnp.maximum(x @ w1 + b1, 0.0)
    return h @ w2 + b2


if __name__ == "__main__":
    # Shapes implied by MLPModel(c_in, c_hidden, c_out, num_layers=2).
    # N=64 with block_m=16 exercises a multi-step (grid=4) pipelined run
    # while staying tiny.
    N, c_in, c_hidden, c_out = 64, 32, 32, 16

    key = jax.random.PRNGKey(0)
    kx, k1, kb1, k2, kb2 = jax.random.split(key, 5)

    x = jax.random.normal(kx, (N, c_in), dtype=jnp.float32)

    # Deterministic parameter init (uniform, PyTorch-Linear-style bound).
    bound1 = 1.0 / (c_in ** 0.5)
    w1 = jax.random.uniform(k1, (c_in, c_hidden), jnp.float32, -bound1, bound1)
    b1 = jax.random.uniform(kb1, (1, c_hidden), jnp.float32, -bound1, bound1)
    bound2 = 1.0 / (c_hidden ** 0.5)
    w2 = jax.random.uniform(k2, (c_hidden, c_out), jnp.float32, -bound2, bound2)
    b2 = jax.random.uniform(kb2, (1, c_out), jnp.float32, -bound2, bound2)

    out = mlp_forward(x, w1, b1, w2, b2, block_m=16)
    out = jax.block_until_ready(out)

    ref = mlp_reference(x, w1, b1, w2, b2)
    assert out.shape == (N, c_out), out.shape
    # bf16 MXU operands -> looser tolerance vs the f32 reference.
    assert jnp.allclose(out, ref, atol=2e-2, rtol=2e-2), "mismatch vs reference"

    print("KERNEL_OK")
</pallas_src>

<mosaic_0001>
module attributes {stable_mosaic.version = 11 : i64} {
  func.func @mlp_kernel(%arg0: i32, %arg1: memref<16x32xf32, #tpu.memory_space<vmem>>, %arg2: memref<32x32xbf16, #tpu.memory_space<vmem>>, %arg3: memref<1x32xf32, #tpu.memory_space<vmem>>, %arg4: memref<32x16xbf16, #tpu.memory_space<vmem>>, %arg5: memref<1x16xf32, #tpu.memory_space<vmem>>, %arg6: memref<16x16xf32, #tpu.memory_space<vmem>>) attributes {dimension_semantics = [#tpu.dimension_semantics<parallel>], iteration_bounds = array<i64: 4>, scalar_prefetch = 0 : i64, scratch_operands = 0 : i64, tpu.core_type = #tpu.core_type<tc>, window_params = [{transform_indices = @transform_0, window_bounds = array<i64: 16, 32>}, {pipeline_mode = #tpu.pipeline_mode<synchronous>, transform_indices = @transform_1, window_bounds = array<i64: 32, 32>}, {pipeline_mode = #tpu.pipeline_mode<synchronous>, transform_indices = @transform_2, window_bounds = array<i64: 1, 32>}, {pipeline_mode = #tpu.pipeline_mode<synchronous>, transform_indices = @transform_3, window_bounds = array<i64: 32, 16>}, {pipeline_mode = #tpu.pipeline_mode<synchronous>, transform_indices = @transform_4, window_bounds = array<i64: 1, 16>}, {transform_indices = @transform_5, window_bounds = array<i64: 16, 16>}]} {
    %c0 = arith.constant 0 : index
    %c0_0 = arith.constant 0 : index
    %0 = vector.load %arg1[%c0, %c0_0] : memref<16x32xf32, #tpu.memory_space<vmem>>, vector<16x32xf32>
    %1 = arith.truncf %0 : vector<16x32xf32> to vector<16x32xbf16>
    %c0_1 = arith.constant 0 : index
    %c0_2 = arith.constant 0 : index
    %2 = vector.load %arg2[%c0_1, %c0_2] : memref<32x32xbf16, #tpu.memory_space<vmem>>, vector<32x32xbf16>
    %cst = arith.constant dense<0.000000e+00> : vector<16x32xf32>
    %3 = tpu.matmul %1, %2, %cst {dimension_numbers = #tpu.dot_dimension_numbers<[1], [0], [0], [1], [0, 0, 1, 1], [], []>} : vector<16x32xbf16>, vector<32x32xbf16>, vector<16x32xf32> -> vector<16x32xf32>
    %c0_3 = arith.constant 0 : index
    %c0_4 = arith.constant 0 : index
    %4 = vector.load %arg3[%c0_3, %c0_4] : memref<1x32xf32, #tpu.memory_space<vmem>>, vector<1x32xf32>
    %5 = vector.broadcast %4 : vector<1x32xf32> to vector<16x32xf32>
    %6 = arith.addf %3, %5 : vector<16x32xf32>
    %cst_5 = arith.constant 0.000000e+00 : f32
    %7 = vector.broadcast %cst_5 : f32 to vector<16x32xf32>
    %8 = arith.maximumf %6, %7 : vector<16x32xf32>
    %9 = arith.truncf %8 : vector<16x32xf32> to vector<16x32xbf16>
    %c0_6 = arith.constant 0 : index
    %c0_7 = arith.constant 0 : index
    %10 = vector.load %arg4[%c0_6, %c0_7] : memref<32x16xbf16, #tpu.memory_space<vmem>>, vector<32x16xbf16>
    %cst_8 = arith.constant dense<0.000000e+00> : vector<16x16xf32>
    %11 = tpu.matmul %9, %10, %cst_8 {dimension_numbers = #tpu.dot_dimension_numbers<[1], [0], [0], [1], [0, 0, 1, 1], [], []>} : vector<16x32xbf16>, vector<32x16xbf16>, vector<16x16xf32> -> vector<16x16xf32>
    %c0_9 = arith.constant 0 : index
    %c0_10 = arith.constant 0 : index
    %12 = vector.load %arg5[%c0_9, %c0_10] : memref<1x16xf32, #tpu.memory_space<vmem>>, vector<1x16xf32>
    %13 = vector.broadcast %12 : vector<1x16xf32> to vector<16x16xf32>
    %14 = arith.addf %11, %13 : vector<16x16xf32>
    %c0_11 = arith.constant 0 : index
    %c0_12 = arith.constant 0 : index
    %15 = vector.load %arg6[%c0_11, %c0_12] : memref<16x16xf32, #tpu.memory_space<vmem>>, vector<16x16xf32>
    tpu.vector_store %arg6[%c0_11, %c0_12], %14 {strides = array<i32>} : memref<16x16xf32, #tpu.memory_space<vmem>>, vector<16x16xf32>,
    return
  }
  func.func @transform_0(%arg0: i32) -> (i32, i32) {
    %c0_i32 = arith.constant 0 : i32
    %c0_i32_0 = arith.constant 0 : i32
    return %arg0, %c0_i32 : i32, i32
  }
  func.func @transform_1(%arg0: i32) -> (i32, i32) {
    %c0_i32 = arith.constant 0 : i32
    %c0_i32_0 = arith.constant 0 : i32
    %c0_i32_1 = arith.constant 0 : i32
    return %c0_i32, %c0_i32_0 : i32, i32
  }
  func.func @transform_2(%arg0: i32) -> (i32, i32) {
    %c0_i32 = arith.constant 0 : i32
    %c0_i32_0 = arith.constant 0 : i32
    %c0_i32_1 = arith.constant 0 : i32
    return %c0_i32, %c0_i32_0 : i32, i32
  }
  func.func @transform_3(%arg0: i32) -> (i32, i32) {
    %c0_i32 = arith.constant 0 : i32
    %c0_i32_0 = arith.constant 0 : i32
    %c0_i32_1 = arith.constant 0 : i32
    return %c0_i32, %c0_i32_0 : i32, i32
  }
  func.func @transform_4(%arg0: i32) -> (i32, i32) {
    %c0_i32 = arith.constant 0 : i32
    %c0_i32_0 = arith.constant 0 : i32
    %c0_i32_1 = arith.constant 0 : i32
    return %c0_i32, %c0_i32_0 : i32, i32
  }
  func.func @transform_5(%arg0: i32) -> (i32, i32) {
    %c0_i32 = arith.constant 0 : i32
    %c0_i32_0 = arith.constant 0 : i32
    return %arg0, %c0_i32 : i32, i32
  }
}

</mosaic_0001>

<bundles_post_ra>
// kernel: tpu_custom_call.1
= control target key start
LH: loop header
LB: loop body
LE: loop exit
PB: predicated region body
PF: predicated region fallthrough
CT: control target
= control target key end

     0   :  { %s524_s18 = smov 0   ;;  %s561_s0 = inlined_call_operand.vmem [shape: f32[64,32], index: 0, kind: input, shape index: {}]   ;;  %s562_s1 = inlined_call_operand.vmem [shape: bf16[32,32], index: 1, kind: input, shape index: {}]   ;;  %s563_s2 = inlined_call_operand.vmem [shape: f32[1,32], index: 2, kind: input, shape index: {}]   ;;  %s564_s3 = inlined_call_operand.vmem [shape: bf16[32,16], index: 3, kind: input, shape index: {}]   ;;  %s565_s4 = inlined_call_operand.vmem [shape: f32[1,16], index: 4, kind: input, shape index: {}]   ;;  %s566_s5 = inlined_call_operand.vmem [shape: f32[64,16], index: 5, kind: output, shape index: {}]  }
   0x1 LB: > { %s429_s19 = sadd.s32 4294967295, %s490_s18   ;;  %p433_p0 = scmp.ge.s32.totalorder %s490_s18, 1  ;;  %s490_s18 = sphi %s524_s18, %s15_s18  }
   0x2   : > { %p188_p1 = scmp.lt.s32.totalorder %s490_s18, 5 }
   0x4   : > { %p189_p2 = pnand %p433_p0, %p188_p1 }
   0x5   : > { %v480_v0 = vld [vmem:[%s562_s1] sm:$0xff] (!%p189_p2)   ;;  %v492_v1 = vmov (!%p189_p2), 0.0   ;;  %v481_v2 = vld [vmem:[%s562_s1 + $0x8] sm:$0xff] (!%p189_p2)   ;;  %vm493_vm0 = vmmov (!%p189_p2), 0   ;;  %s434_s24 = sshll.u32 (!%p189_p2), %s429_s19, 1  ;;  %vm255_vm1 = vcmask (!%p189_p2), 261120  }
   0x6   : > { %192 = sbr.rel (%p189_p2) target bundleno = 456 (0x1c8), region = 40  ;;  %454 = vmatprep.subr.bf16.mxu0 (!%p189_p2), %v492_v1  ;;  %462 = vmatprep.subr.bf16.mxu1 (!%p189_p2), %v492_v1  ;;  %p217_p3 = scmp.lt.s32.totalorder (!%p189_p2), %s434_s24, 7  ;;  %v482_v6 = vld [vmem:[%s564_s3] sm:$0xff] (!%p189_p2)   ;;  %v483_v7 = vld [vmem:[%s564_s3 + $0x8] sm:$0xff] (!%p189_p2)   ;;  %vm370_vm2 = vcmask (!%p189_p2), 130048  }
   0x7   : > { %455 = vmatpush3.bf16.msra.mxu0 (!%p189_p2), %v480_v0  ;;  %458 = vmatprep.mubr.msk.bf16.mxu0 (!%p189_p2), %vm493_vm0, %v492_v1  ;;  %v438_v8 = vld [vmem:[%s563_s2] ss:$0 sm:$0xff] (!%p189_p2) }
   0x8   : > { %456 = vmatprep.subr.bf16.mxu0 (!%p189_p2), %v492_v1  ;;  %466 = vmatprep.mubr.msk.bf16.mxu1 (!%p189_p2), %vm493_vm0, %v492_v1  ;;  %v442_v18 = vld [vmem:[%s565_s4] ss:$0 sm:$0xff] (!%p189_p2) }
   0x9   : > { %463 = vmatpush3.bf16.msra.mxu1 (!%p189_p2), %v482_v6 }
   0xa   : > { %464 = vmatprep.subr.bf16.mxu1 (!%p189_p2), %v492_v1 }
   0xb   : > { %457 = vmatpush3.bf16.msra.mxu0 (!%p189_p2), %v481_v2 }
   0xd   : > { %s568_s24 = smov (!%p217_p3, %s434_s24), 7  ;;  %465 = vmatpush3.bf16.msra.mxu1 %v483_v7 }
   0xe   : > { %s435_s25 = sshll.u32 %s568_s24, 3 }
   0xf   : > { %s220_s28 = scalar_lea.vmem %s561_s0, %s435_s25  ;;  %s226_s14 = scalar_lea.vmem %s566_s5, %s435_s25 }
  0x10   : > { %v229_v3 = vld [vmem:[%s220_s28] sm:$0xff]  ;;  %v230_v4 = vld [vmem:[%s220_s28 + $0x8] sm:$0xff] }
  0x11   : > { %v231_v5 = vpack.c.bf16 %v230_v4, %v229_v3 }
  0x13   : > { %459 = vmatmul.mubr.msk.bf16.vlgmr.msra.gmra.mrb[0].mxu0 %vm255_vm1, %v231_v5 }
  0xe6   : > { %v293_v9 = vpop.f32.mrb[0].mxu0 }
  0xe7   : > { %v294_v10 = vadd.f32 %v438_v8, %v293_v9  ;;  %v460_v11 = vpop.f32.mrb[1].mxu0 }
  0xe8   : > { %v296_v12 = vpop.f32.mrb[2].mxu0 }
  0xe9   : > { %v297_v13 = vadd.f32 %v438_v8, %v296_v12  ;;  %v461_v14 = vpop.f32.mrb[3].mxu0  ;;  %v300_v15 = vmax.f32 %v294_v10, 0.0 }
  0xeb   : > { %v301_v16 = vmax.f32 %v297_v13, 0.0 }
  0xed   : > { %v302_v17 = vpack.c.bf16 %v301_v16, %v300_v15 }
  0xef   : > { %467 = vmatmul.mubr.msk.bf16.vlgmr.msra.gmra.mrb[0].mxu1 %vm255_vm1, %v302_v17 }
 0x1c2   : > { %v363_v19 = vpop.f32.mrb[0].mxu1 }
 0x1c3   : > { %v364_v20 = vadd.f32 %v442_v18, %v363_v19  ;;  %v468_v21 = vpop.f32.mrb[1].mxu1 }
 0x1c4   : > { %v366_v22 = vpop.f32.mrb[2].mxu1 }
 0x1c5   : > { %371 = vst.msk [vmem:[%s226_s14] sm:$0xff] %vm370_vm2, %v364_v20  ;;  %v367_v23 = vadd.f32 %v442_v18, %v366_v22  ;;  %v469_v24 = vpop.f32.mrb[3].mxu1 }
 0x1c7   : > { %372 = vst.msk [vmem:[%s226_s14 + $0x8] sm:$0xff] %vm370_vm2, %v367_v23 }
 0x1c8 PF: > { %s15_s18 = sadd.s32 1, %s490_s18  }
 0x1c9   : > { %p12_p4 = scmp.ge.s32.totalorder %s15_s18, 6  }
 0x1cb   :  { %14 = sbr.rel (!%p12_p4) target bundleno = 1 (0x1), region = 70 }

</bundles_post_ra>
